<compile_context>
chip_gen: v7x
topology: tpu7x:2x2x1
jax: 0.10.0
libtpu: 0.0.40
codegen_flags: <defaults>
</compile_context>

<pallas_src>
import functools
import math

import jax
import jax.numpy as jnp
from jax.experimental import pallas as pl
from jax.experimental.pallas import tpu as pltpu

# ----------------------------------------------------------------------------
# Hyper-parameters (small, but with a lane-dense model dim = 128)
# ----------------------------------------------------------------------------
BATCH = 2
SEQ = 16
DIM = 128
N_HEADS = 4
HEAD_DIM = DIM // N_HEADS
ROPE_THETA = 10000.0


# ----------------------------------------------------------------------------
# Kernel 1: fused QKV projection + RoPE (+ 1/sqrt(head_dim) folded into q)
# ----------------------------------------------------------------------------
def _qkv_rope_kernel(x_ref, wqkv_ref, cos_ref, sin_ref, pswap_ref, qkv_ref,
                     *, dim, q_scale):
    x = x_ref[...]                                             # (S, D)
    wqkv = wqkv_ref[...]                                       # (D, 3D)
    qkv = jnp.dot(x, wqkv, preferred_element_type=jnp.float32)  # (S, 3D)
    q = qkv[:, 0:dim]
    k = qkv[:, dim:2 * dim]
    v = qkv[:, 2 * dim:3 * dim]

    cos = cos_ref[...]                                         # (S, D) pair-expanded
    sin = sin_ref[...]                                         # (S, D)
    pswap = pswap_ref[...]                                     # (D, D) signed pair-swap
    # RoPE:  out[2i]   = x[2i]*cos_i - x[2i+1]*sin_i
    #        out[2i+1] = x[2i+1]*cos_i + x[2i]*sin_i
    # The "swap adjacent pair with sign" is one MXU matmul against pswap.
    q_sw = jnp.dot(q, pswap, preferred_element_type=jnp.float32)
    k_sw = jnp.dot(k, pswap, preferred_element_type=jnp.float32)
    q_rot = q * cos + q_sw * sin
    k_rot = k * cos + k_sw * sin

    qkv_ref[:, 0:dim] = (q_rot * q_scale).astype(qkv_ref.dtype)
    qkv_ref[:, dim:2 * dim] = k_rot.astype(qkv_ref.dtype)
    qkv_ref[:, 2 * dim:3 * dim] = v.astype(qkv_ref.dtype)


def fused_qkv_rope(x, wqkv, cos_t, sin_t, pswap, *, q_scale):
    b, s, d = x.shape
    kernel = functools.partial(_qkv_rope_kernel, dim=d, q_scale=q_scale)
    return pl.pallas_call(
        kernel,
        grid=(b,),
        in_specs=[
            pl.BlockSpec((None, s, d), lambda i: (i, 0, 0)),
            pl.BlockSpec((d, 3 * d), lambda i: (0, 0)),
            pl.BlockSpec((s, d), lambda i: (0, 0)),
            pl.BlockSpec((s, d), lambda i: (0, 0)),
            pl.BlockSpec((d, d), lambda i: (0, 0)),
        ],
        out_specs=pl.BlockSpec((None, s, 3 * d), lambda i: (i, 0, 0)),
        out_shape=jax.ShapeDtypeStruct((b, s, 3 * d), jnp.float32),
        compiler_params=pltpu.CompilerParams(dimension_semantics=("parallel",)),
    )(x, wqkv, cos_t, sin_t, pswap)


# ----------------------------------------------------------------------------
# Kernel 2: all-heads attention + fused output projection
# ----------------------------------------------------------------------------
def _attn_kernel(q_ref, k_ref, v_ref, mask_ref, wo_ref, o_ref,
                 *, n_heads, head_dim):
    q = q_ref[...]                      # (H, S, hd), already scaled by 1/sqrt(hd)
    k = k_ref[...]                      # (H, S, hd)
    v = v_ref[...]                      # (H, S, hd)
    mask = mask_ref[...]                # (S, S) additive mask

    # Batched over heads in one shot (no per-head Python loop in the hot path).
    s = jnp.einsum('hqd,hkd->hqk', q, k, preferred_element_type=jnp.float32)
    s = s + mask[None, :, :]
    m = jnp.max(s, axis=-1, keepdims=True)
    e = jnp.exp(s - m)
    denom = jnp.sum(e, axis=-1, keepdims=True)
    o = jnp.einsum('hqk,hkd->hqd', e, v, preferred_element_type=jnp.float32)
    # Deferred softmax normalization: scale the (H,S,hd) output, reciprocal on EUP.
    o = o * pl.reciprocal(denom, approx=True)

    # Fused output projection: sum_h o_h @ Wo[h*hd:(h+1)*hd, :]  ==  concat(o) @ Wo
    wo = wo_ref[...]                    # (H*hd, D)
    acc = jnp.dot(o[0], wo[0:head_dim, :], preferred_element_type=jnp.float32)
    for h in range(1, n_heads):         # tiny static accumulation (MXU), not hot
        acc = acc + jnp.dot(o[h], wo[h * head_dim:(h + 1) * head_dim, :],
                            preferred_element_type=jnp.float32)
    o_ref[...] = acc.astype(o_ref.dtype)


def fused_attention(q, k, v, mask, wo):
    b, h, s, hd = q.shape
    d = h * hd
    kernel = functools.partial(_attn_kernel, n_heads=h, head_dim=hd)
    return pl.pallas_call(
        kernel,
        grid=(b,),
        in_specs=[
            pl.BlockSpec((None, h, s, hd), lambda i: (i, 0, 0, 0)),
            pl.BlockSpec((None, h, s, hd), lambda i: (i, 0, 0, 0)),
            pl.BlockSpec((None, h, s, hd), lambda i: (i, 0, 0, 0)),
            pl.BlockSpec((s, s), lambda i: (0, 0)),
            pl.BlockSpec((d, d), lambda i: (0, 0)),
        ],
        out_specs=pl.BlockSpec((None, s, d), lambda i: (i, 0, 0)),
        out_shape=jax.ShapeDtypeStruct((b, s, d), jnp.float32),
        compiler_params=pltpu.CompilerParams(dimension_semantics=("parallel",)),
    )(q, k, v, mask, wo)


# ----------------------------------------------------------------------------
# Wrapper: full Attention.forward(x, start_pos, freqs_cis, mask)
# ----------------------------------------------------------------------------
def _signed_pair_swap(d):
    # P[2i+1, 2i] = -1, P[2i, 2i+1] = +1  so that (x @ P)[2i] = -x[2i+1],
    # (x @ P)[2i+1] = x[2i].
    r = jnp.arange(d)[:, None]
    c = jnp.arange(d)[None, :]
    plus = ((c == r + 1) & (r % 2 == 0)).astype(jnp.float32)
    minus = ((c == r - 1) & (r % 2 == 1)).astype(jnp.float32)
    return plus - minus


def attention_forward(params, x, start_pos, cos, sin, mask):
    """Pallas forward matching Attention.forward.  freqs_cis is given as
    (cos, sin), each (S, head_dim//2).  The reference forward has no KV cache,
    so start_pos does not enter the computation."""
    del start_pos
    b, s, d = x.shape
    h = N_HEADS
    hd = d // h
    wqkv = jnp.concatenate([params['wq'], params['wk'], params['wv']], axis=1)  # (D,3D)
    # Expand RoPE tables to flat (S, D): each freq repeated over its pair, tiled per head.
    cos_full = jnp.tile(jnp.repeat(cos, 2, axis=-1), (1, h))   # (S, D)
    sin_full = jnp.tile(jnp.repeat(sin, 2, axis=-1), (1, h))   # (S, D)
    pswap = _signed_pair_swap(d)
    q_scale = 1.0 / math.sqrt(hd)

    qkv = fused_qkv_rope(x, wqkv, cos_full, sin_full, pswap, q_scale=q_scale)  # (B,S,3D)

    def split_heads(t):  # wrapper-side layout plumbing (XLA)
        return t.reshape(b, s, h, hd).transpose(0, 2, 1, 3)    # (B,H,S,hd)

    q = split_heads(qkv[..., 0:d])
    k = split_heads(qkv[..., d:2 * d])
    v = split_heads(qkv[..., 2 * d:3 * d])
    return fused_attention(q, k, v, mask, params['wo'])


# ----------------------------------------------------------------------------
# Pure-JAX reference (mirrors the PyTorch module exactly)
# ----------------------------------------------------------------------------
def attention_ref(params, x, cos, sin, mask):
    b, s, d = x.shape
    h = N_HEADS
    hd = d // h
    q = (x @ params['wq']).reshape(b, s, h, hd)
    k = (x @ params['wk']).reshape(b, s, h, hd)
    v = (x @ params['wv']).reshape(b, s, h, hd)

    def rope(t):
        tr = t[..., 0::2]
        ti = t[..., 1::2]
        c = cos[None, :, None, :]
        si = sin[None, :, None, :]
        out_r = tr * c - ti * si
        out_i = tr * si + ti * c
        return jnp.stack([out_r, out_i], axis=-1).reshape(b, s, h, hd)

    q, k = rope(q), rope(k)
    q, k, v = (t.transpose(0, 2, 1, 3) for t in (q, k, v))
    scores = jnp.einsum('bhqd,bhkd->bhqk', q, k) / math.sqrt(hd) + mask[None, None]
    probs = jax.nn.softmax(scores, axis=-1)
    o = jnp.einsum('bhqk,bhkd->bhqd', probs, v)
    o = o.transpose(0, 2, 1, 3).reshape(b, s, d)
    return o @ params['wo']


# ----------------------------------------------------------------------------
# Main
# ----------------------------------------------------------------------------
if __name__ == "__main__":
    key = jax.random.PRNGKey(0)
    kx, kq, kk, kv, ko = jax.random.split(key, 5)
    params = {
        'wq': jax.random.normal(kq, (DIM, DIM), jnp.float32) / math.sqrt(DIM),
        'wk': jax.random.normal(kk, (DIM, DIM), jnp.float32) / math.sqrt(DIM),
        'wv': jax.random.normal(kv, (DIM, DIM), jnp.float32) / math.sqrt(DIM),
        'wo': jax.random.normal(ko, (DIM, DIM), jnp.float32) / math.sqrt(DIM),
    }
    x = jax.random.normal(kx, (BATCH, SEQ, DIM), jnp.float32)

    # RoPE tables (real/imag of freqs_cis), shape (S, head_dim // 2).
    inv_freq = 1.0 / (ROPE_THETA ** (
        jnp.arange(0, HEAD_DIM, 2, dtype=jnp.float32) / HEAD_DIM))
    t = jnp.arange(SEQ, dtype=jnp.float32)
    angles = jnp.outer(t, inv_freq)
    cos, sin = jnp.cos(angles), jnp.sin(angles)

    # Causal additive mask (S, S).
    ii = jnp.arange(SEQ)[:, None]
    jj = jnp.arange(SEQ)[None, :]
    mask = jnp.where(jj <= ii, 0.0, -1e9).astype(jnp.float32)

    out = attention_forward(params, x, 0, cos, sin, mask)
    jax.block_until_ready(out)
    assert out.shape == (BATCH, SEQ, DIM)

    ref = attention_ref(params, x, cos, sin, mask)
    max_err = float(jnp.max(jnp.abs(out - ref)))
    assert max_err < 2e-2, f"max abs error vs reference = {max_err}"
    print("KERNEL_OK")
</pallas_src>

<mosaic_0001>
module attributes {stable_mosaic.version = 11 : i64} {
  func.func @_qkv_rope_kernel(%arg0: i32, %arg1: memref<1x16x128xf32, #tpu.memory_space<vmem>>, %arg2: memref<128x384xf32, #tpu.memory_space<vmem>>, %arg3: memref<16x128xf32, #tpu.memory_space<vmem>>, %arg4: memref<16x128xf32, #tpu.memory_space<vmem>>, %arg5: memref<128x128xf32, #tpu.memory_space<vmem>>, %arg6: memref<1x16x384xf32, #tpu.memory_space<vmem>>) attributes {dimension_semantics = [#tpu.dimension_semantics<parallel>], iteration_bounds = array<i64: 2>, scalar_prefetch = 0 : i64, scratch_operands = 0 : i64, tpu.core_type = #tpu.core_type<tc>, window_params = [{transform_indices = @transform_0, window_bounds = array<i64: 1, 16, 128>}, {pipeline_mode = #tpu.pipeline_mode<synchronous>, transform_indices = @transform_1, window_bounds = array<i64: 128, 384>}, {pipeline_mode = #tpu.pipeline_mode<synchronous>, transform_indices = @transform_2, window_bounds = array<i64: 16, 128>}, {pipeline_mode = #tpu.pipeline_mode<synchronous>, transform_indices = @transform_3, window_bounds = array<i64: 16, 128>}, {pipeline_mode = #tpu.pipeline_mode<synchronous>, transform_indices = @transform_4, window_bounds = array<i64: 128, 128>}, {transform_indices = @transform_5, window_bounds = array<i64: 1, 16, 384>}]} {
    %c0 = arith.constant 0 : index
    %c0_0 = arith.constant 0 : index
    %c0_1 = arith.constant 0 : index
    %0 = vector.load %arg1[%c0, %c0_0, %c0_1] : memref<1x16x128xf32, #tpu.memory_space<vmem>>, vector<1x16x128xf32>
    %1 = vector.shape_cast %0 : vector<1x16x128xf32> to vector<16x128xf32>
    %c0_2 = arith.constant 0 : index
    %c0_3 = arith.constant 0 : index
    %2 = vector.load %arg2[%c0_2, %c0_3] : memref<128x384xf32, #tpu.memory_space<vmem>>, vector<128x384xf32>
    %cst = arith.constant dense<0.000000e+00> : vector<16x384xf32>
    %3 = tpu.matmul %1, %2, %cst {dimension_numbers = #tpu.dot_dimension_numbers<[1], [0], [0], [1], [0, 0, 1, 1], [], []>} : vector<16x128xf32>, vector<128x384xf32>, vector<16x384xf32> -> vector<16x384xf32>
    %4 = vector.extract_strided_slice %3 {offsets = [0, 0], sizes = [16, 128], strides = [1, 1]} : vector<16x384xf32> to vector<16x128xf32>
    %5 = vector.extract_strided_slice %3 {offsets = [0, 128], sizes = [16, 128], strides = [1, 1]} : vector<16x384xf32> to vector<16x128xf32>
    %6 = vector.extract_strided_slice %3 {offsets = [0, 256], sizes = [16, 128], strides = [1, 1]} : vector<16x384xf32> to vector<16x128xf32>
    %c0_4 = arith.constant 0 : index
    %c0_5 = arith.constant 0 : index
    %7 = vector.load %arg3[%c0_4, %c0_5] : memref<16x128xf32, #tpu.memory_space<vmem>>, vector<16x128xf32>
    %c0_6 = arith.constant 0 : index
    %c0_7 = arith.constant 0 : index
    %8 = vector.load %arg4[%c0_6, %c0_7] : memref<16x128xf32, #tpu.memory_space<vmem>>, vector<16x128xf32>
    %c0_8 = arith.constant 0 : index
    %c0_9 = arith.constant 0 : index
    %9 = vector.load %arg5[%c0_8, %c0_9] : memref<128x128xf32, #tpu.memory_space<vmem>>, vector<128x128xf32>
    %cst_10 = arith.constant dense<0.000000e+00> : vector<16x128xf32>
    %10 = tpu.matmul %4, %9, %cst_10 {dimension_numbers = #tpu.dot_dimension_numbers<[1], [0], [0], [1], [0, 0, 1, 1], [], []>} : vector<16x128xf32>, vector<128x128xf32>, vector<16x128xf32> -> vector<16x128xf32>
    %cst_11 = arith.constant dense<0.000000e+00> : vector<16x128xf32>
    %11 = tpu.matmul %5, %9, %cst_11 {dimension_numbers = #tpu.dot_dimension_numbers<[1], [0], [0], [1], [0, 0, 1, 1], [], []>} : vector<16x128xf32>, vector<128x128xf32>, vector<16x128xf32> -> vector<16x128xf32>
    %12 = arith.mulf %4, %7 : vector<16x128xf32>
    %13 = arith.mulf %10, %8 : vector<16x128xf32>
    %14 = arith.addf %12, %13 : vector<16x128xf32>
    %15 = arith.mulf %5, %7 : vector<16x128xf32>
    %16 = arith.mulf %11, %8 : vector<16x128xf32>
    %17 = arith.addf %15, %16 : vector<16x128xf32>
    %cst_12 = arith.constant 0.176776692 : f32
    %18 = vector.broadcast %cst_12 : f32 to vector<16x128xf32>
    %19 = arith.mulf %14, %18 : vector<16x128xf32>
    %c0_13 = arith.constant 0 : index
    %c0_14 = arith.constant 0 : index
    %c0_15 = arith.constant 0 : index
    %20 = vector.load %arg6[%c0_13, %c0_14, %c0_15] : memref<1x16x384xf32, #tpu.memory_space<vmem>>, vector<1x16x128xf32>
    %21 = vector.shape_cast %20 : vector<1x16x128xf32> to vector<16x128xf32>
    %22 = vector.shape_cast %19 : vector<16x128xf32> to vector<1x16x128xf32>
    tpu.vector_store %arg6[%c0_13, %c0_14, %c0_15], %22 {strides = array<i32>} : memref<1x16x384xf32, #tpu.memory_space<vmem>>, vector<1x16x128xf32>,
    %c0_16 = arith.constant 0 : index
    %c0_17 = arith.constant 0 : index
    %c128 = arith.constant 128 : index
    %23 = vector.load %arg6[%c0_16, %c0_17, %c128] : memref<1x16x384xf32, #tpu.memory_space<vmem>>, vector<1x16x128xf32>
    %24 = vector.shape_cast %23 : vector<1x16x128xf32> to vector<16x128xf32>
    %25 = vector.shape_cast %17 : vector<16x128xf32> to vector<1x16x128xf32>
    tpu.vector_store %arg6[%c0_16, %c0_17, %c128], %25 {strides = array<i32>} : memref<1x16x384xf32, #tpu.memory_space<vmem>>, vector<1x16x128xf32>,
    %c0_18 = arith.constant 0 : index
    %c0_19 = arith.constant 0 : index
    %c256 = arith.constant 256 : index
    %26 = vector.load %arg6[%c0_18, %c0_19, %c256] : memref<1x16x384xf32, #tpu.memory_space<vmem>>, vector<1x16x128xf32>
    %27 = vector.shape_cast %26 : vector<1x16x128xf32> to vector<16x128xf32>
    %28 = vector.shape_cast %6 : vector<16x128xf32> to vector<1x16x128xf32>
    tpu.vector_store %arg6[%c0_18, %c0_19, %c256], %28 {strides = array<i32>} : memref<1x16x384xf32, #tpu.memory_space<vmem>>, vector<1x16x128xf32>,
    return
  }
  func.func @transform_0(%arg0: i32) -> (i32, i32, i32) {
    %c0_i32 = arith.constant 0 : i32
    %c0_i32_0 = arith.constant 0 : i32
    %c0_i32_1 = arith.constant 0 : i32
    return %arg0, %c0_i32, %c0_i32_0 : i32, i32, i32
  }
  func.func @transform_1(%arg0: i32) -> (i32, i32) {
    %c0_i32 = arith.constant 0 : i32
    %c0_i32_0 = arith.constant 0 : i32
    %c0_i32_1 = arith.constant 0 : i32
    return %c0_i32, %c0_i32_0 : i32, i32
  }
  func.func @transform_2(%arg0: i32) -> (i32, i32) {
    %c0_i32 = arith.constant 0 : i32
    %c0_i32_0 = arith.constant 0 : i32
    %c0_i32_1 = arith.constant 0 : i32
    return %c0_i32, %c0_i32_0 : i32, i32
  }
  func.func @transform_3(%arg0: i32) -> (i32, i32) {
    %c0_i32 = arith.constant 0 : i32
    %c0_i32_0 = arith.constant 0 : i32
    %c0_i32_1 = arith.constant 0 : i32
    return %c0_i32, %c0_i32_0 : i32, i32
  }
  func.func @transform_4(%arg0: i32) -> (i32, i32) {
    %c0_i32 = arith.constant 0 : i32
    %c0_i32_0 = arith.constant 0 : i32
    %c0_i32_1 = arith.constant 0 : i32
    return %c0_i32, %c0_i32_0 : i32, i32
  }
  func.func @transform_5(%arg0: i32) -> (i32, i32, i32) {
    %c0_i32 = arith.constant 0 : i32
    %c0_i32_0 = arith.constant 0 : i32
    %c0_i32_1 = arith.constant 0 : i32
    return %arg0, %c0_i32, %c0_i32_0 : i32, i32, i32
  }
}

</mosaic_0001>

<bundles_post_ra>
// kernel: tpu_custom_call.1
= control target key start
LH: loop header
LB: loop body
LE: loop exit
PB: predicated region body
PF: predicated region fallthrough
CT: control target
= control target key end

     0   :  { %10 = vsyncpa [#allocation3], 0  ;;  %s1774_s0 = inlined_call_operand.hbm [shape: f32[2,16,128], index: 0, kind: input, shape index: {}]   ;;  %s1775_s1 = inlined_call_operand.hbm [shape: f32[128,384], index: 1, kind: input, shape index: {}]   ;;  %s1776_s2 = inlined_call_operand.hbm [shape: f32[16,128], index: 2, kind: input, shape index: {}]   ;;  %s1777_s3 = inlined_call_operand.hbm [shape: f32[16,128], index: 3, kind: input, shape index: {}]   ;;  %s1778_s4 = inlined_call_operand.hbm [shape: f32[128,128], index: 4, kind: input, shape index: {}]   ;;  %s1779_s5 = inlined_call_operand.hbm [shape: f32[2,16,384], index: 5, kind: output, shape index: {}]  }
   0x1   :  { %12 = vsyncpa [#allocation3 + $0x1], 0 }
   0x2   :  { %13 = vsyncpa [#allocation6], 0 }
   0x3   :  { %14 = vsyncpa [#allocation9], 0 }
   0x4   :  { %15 = vsyncpa [#allocation4], 0 }
   0x5   :  { %17 = vsyncpa [#allocation4 + $0x1], 0  ;;  %s1482_s18 = smov 0   ;;  %s1484_s19 = smov 0  }
   0x6   :  { %s1486_s20 = smov 0   ;;  %s1488_s21 = smov 0  }
   0x7 LB: > { %s1503_s22 = sadd.s32 4294967295, %s1437_s21   ;;  %s818_s23 = sadd.s32 4294967294, %s1437_s21   ;;  %s1437_s21 = sphi %s1488_s21, %s1802_s21   ;;  %s1433_s20 = sphi %s1486_s20, %s1801_s20   ;;  %s1429_s19 = sphi %s1484_s19, %s1800_s19   ;;  %s1425_s18 = sphi %s1482_s18, %s1799_s18  }
   0x8   : > { %p43_p0 = scmp.ne.s32.totalorder %s1429_s19, %s1425_s18  ;;  %p1780_p1 = scmp.eq.s32.totalorder %s1503_s22, 0 }
   0x9   : > { %p157_p3 = scmp.eq.s32.totalorder %s818_s23, 1  ;;  %p819_p5 = scmp.ge.s32.totalorder %s1437_s21, 1 }
   0xa   : > { %p1512_p4 = por %p1780_p1, %p43_p0  ;;  %p164_p7 = scmp.lt.s32.totalorder %s1437_s21, 3 }
   0xb   : > { %p1517_p6 = por %p157_p3, %p43_p0  ;;  %s1439_s27 = smov [#allocation5]  }
   0xc   : > { %s1783_s24 = scalar_select %p1512_p4, 1, 0 }
   0xd   : > { %s1784_s25 = scalar_select %p1517_p6, 1, 0 }
   0xe   : > { %p1522_p8 = pnand %p819_p5, %p164_p7  ;;  %s176_s28 = sshll.u32 %s1439_s27, 4  ;;  %s177_s28 = int_to_ptr.vmem [resolvable:$true] %s176_s28 }
   0xf   : > { %s1440_s30 = smov [#allocation8]   ;;  %s1221_s9 = scalar_lea.hbm %s1775_s1, 6144 }
  0x10   : > { %s1785_s26 = scalar_select %p1522_p8, 1, 0 }
  0x11   : > { %p1147_p9 = pneg %p1522_p8  ;;  %s202_s6 = sshll.u32 %s1440_s30, 4  ;;  %s203_s6 = int_to_ptr.vmem [resolvable:$true] %s202_s6 }
  0x12   : > { %p1222_p12 = scmp.ne.s32.totalorder %s1775_s1, %s1221_s9  ;;  %p1228_p5 = scmp.lt.u32.totalorder %s1221_s9, %s1775_s1 }
  0x13   : > { %p1531_p11 = pnand %p1147_p9, %p1780_p1 }
  0x15   : > { %p1543_p13 = pneg %p1531_p11 }
  0x17   : > { %p1224_p0 = pnand %p1543_p13, %p1222_p12 }
  0x19   : > { %p1225_p3 = pneg %p1224_p0 }
  0x1b   : > { %p1230_p7 = pnand %p1228_p5, %p1225_p3 }
  0x1d   : > { %1233 = shalt.err (!%p1230_p7)
}
  0x1e   : > { %s1234_s15 = scalar_lea.vmem %s177_s28, 6144  ;;  %p1242_p2 = scmp.lt.s32.totalorder %s177_s28, %s177_s28 }
  0x1f   : > { %p1235_p9 = scmp.ne.s32.totalorder %s177_s28, %s1234_s15  ;;  %p1243_p6 = scmp.lt.s32.totalorder %s1234_s15, %s1234_s15 }
  0x21   : > { %p1237_p10 = pnand %p1235_p9, %p1543_p13  ;;  %p1244_p4 = por %p1243_p6, %p1242_p2 }
  0x23   : > { %p1238_p1 = pneg %p1237_p10 }
  0x25   : > { %p1245_p8 = pnand %p1244_p4, %p1238_p1 }
  0x27   : > { %1248 = shalt.err (!%p1245_p8)
}
  0x28   : > { %s1441_s16 = smov 384   ;;  %s1442_s17 = smov 24  }
  0x29   : > { %1150 = dma.hbm_to_vmem [thread:$0]  (!%p1531_p11), %s1775_s1, 6144, %s177_s28, [#allocation6], %s1441_s16, %s1441_s16, %s1442_s17  }
  0x2a   : > { %s1443_s30 = smov [#allocation7]   ;;  %s1249_s10 = scalar_lea.hbm %s1777_s3, 256 }
  0x2b   : > { %s189_s7 = sshll.u32 %s1443_s30, 4  ;;  %p1250_p1 = scmp.ne.s32.totalorder %s1777_s3, %s1249_s10  ;;  %s190_s7 = int_to_ptr.vmem [resolvable:$true] %s189_s7 }
  0x2c   : > { %p1256_p6 = scmp.lt.u32.totalorder %s1249_s10, %s1777_s3 }
  0x2d   : > { %p1252_p2 = pnand %p1250_p1, %p1543_p13 }
  0x2f   : > { %p1253_p4 = pneg %p1252_p2 }
  0x31   : > { %p1258_p8 = pnand %p1256_p6, %p1253_p4 }
  0x33   : > { %1261 = shalt.err (!%p1258_p8)
}
  0x34   : > { %s1262_s28 = scalar_lea.vmem %s203_s6, 256  ;;  %p1270_p3 = scmp.lt.s32.totalorder %s203_s6, %s203_s6 }
  0x35   : > { %p1263_p10 = scmp.ne.s32.totalorder %s203_s6, %s1262_s28  ;;  %p1271_p5 = scmp.lt.s32.totalorder %s1262_s28, %s1262_s28 }
  0x37   : > { %p1265_p12 = pnand %p1263_p10, %p1543_p13  ;;  %p1272_p7 = por %p1271_p5, %p1270_p3 }
  0x39   : > { %p1266_p0 = pneg %p1265_p12 }
  0x3b   : > { %p1273_p9 = pnand %p1272_p7, %p1266_p0 }
  0x3d   : > { %1276 = shalt.err (!%p1273_p9)
}
  0x3e   : > { %s1444_s16 = smov 128   ;;  %s1445_s17 = smov 8  }
  0x3f   : > { %1156 = dma.hbm_to_vmem [thread:$0]  (!%p1531_p11), %s1777_s3, 256, %s203_s6, [#allocation9], %s1444_s16, %s1444_s16, %s1445_s17  }
  0x40   : > { %s1277_s9 = scalar_lea.hbm %s1776_s2, 256 }
  0x41   : > { %p1278_p1 = scmp.ne.s32.totalorder %s1776_s2, %s1277_s9  ;;  %p1284_p6 = scmp.lt.u32.totalorder %s1277_s9, %s1776_s2 }
  0x43   : > { %p1280_p2 = pnand %p1278_p1, %p1543_p13 }
  0x45   : > { %p1281_p4 = pneg %p1280_p2 }
  0x47   : > { %p1286_p8 = pnand %p1284_p6, %p1281_p4 }
  0x49   : > { %1289 = shalt.err (!%p1286_p8)
}
  0x4a   : > { %s1290_s15 = scalar_lea.vmem %s190_s7, 256  ;;  %p1298_p3 = scmp.lt.s32.totalorder %s190_s7, %s190_s7 }
  0x4b   : > { %p1291_p10 = scmp.ne.s32.totalorder %s190_s7, %s1290_s15  ;;  %p1299_p5 = scmp.lt.s32.totalorder %s1290_s15, %s1290_s15 }
  0x4d   : > { %p1293_p12 = pnand %p1291_p10, %p1543_p13  ;;  %p1300_p7 = por %p1299_p5, %p1298_p3 }
  0x4f   : > { %p1294_p0 = pneg %p1293_p12 }
  0x51   : > { %p1301_p9 = pnand %p1300_p7, %p1294_p0 }
  0x53   : > { %1304 = shalt.err (!%p1301_p9)
}
  0x54   : > { %1153 = dma.hbm_to_vmem [thread:$0]  (!%p1531_p11), %s1776_s2, 256, %s190_s7, [#allocation6], %s1444_s16, %s1444_s16, %s1445_s17  }
  0x55   : > { %s1446_s23 = smov [#allocation10]   ;;  %s1305_s9 = scalar_lea.hbm %s1778_s4, 2048 }
  0x56   : > { %s215_s27 = sshll.u32 %s1446_s23, 4  ;;  %p1306_p1 = scmp.ne.s32.totalorder %s1778_s4, %s1305_s9  ;;  %s216_s27 = int_to_ptr.vmem [resolvable:$true] %s215_s27 }
  0x57   : > { %p1312_p6 = scmp.lt.u32.totalorder %s1305_s9, %s1778_s4 }
  0x58   : > { %p1308_p2 = pnand %p1306_p1, %p1543_p13 }
  0x5a   : > { %p1309_p4 = pneg %p1308_p2 }
  0x5c   : > { %p1314_p8 = pnand %p1312_p6, %p1309_p4 }
  0x5e   : > { %1317 = shalt.err (!%p1314_p8)
}
  0x5f   : > { %s1318_s7 = scalar_lea.vmem %s216_s27, 2048  ;;  %p1326_p3 = scmp.lt.s32.totalorder %s216_s27, %s216_s27 }
  0x60   : > { %p1319_p10 = scmp.ne.s32.totalorder %s216_s27, %s1318_s7  ;;  %p1327_p5 = scmp.lt.s32.totalorder %s1318_s7, %s1318_s7 }
  0x62   : > { %p1321_p12 = pnand %p1319_p10, %p1543_p13  ;;  %p1328_p7 = por %p1327_p5, %p1326_p3 }
  0x64   : > { %p1322_p0 = pneg %p1321_p12 }
  0x66   : > { %p1329_p9 = pnand %p1328_p7, %p1322_p0 }
  0x68   : > { %1332 = shalt.err (!%p1329_p9)
}
  0x69   : > { %1159 = dma.hbm_to_vmem [thread:$0]  (!%p1531_p11), %s1778_s4, 2048, %s216_s27, [#allocation9], %s1444_s16, %s1444_s16, %s1445_s17  }
  0x6a   : > { %s1623_s12 = sadd.s32 1, %s1437_s21   ;;  %s30_s29 = sadd.s32 1, %s1433_s20 }
  0x6b   : > { %s27_s28 = ssub.s32 %s1437_s21, %s1623_s12  ;;  %p37_p13 = scmp.ne.s32.totalorder %s1433_s20, %s1429_s19 }
  0x6c   : > { %p28_p1 = scmp.eq.s32.totalorder %s27_s28, 0  ;;  %p38_p2 = scmp.eq.s32.totalorder %s1437_s21, 0 }
  0x6d   : > { %p1788_p4 = scmp.eq.s32.totalorder %s1503_s22, 1  ;;  %p1172_p8 = scmp.lt.s32.totalorder %s1437_s21, 2 }
  0x6e   : > { %s1639_s30 = scalar_select %p28_p1, %s1433_s20, %s30_s29  }
  0x6f   : > { %p1633_p6 = por %p1788_p4, %p37_p13  ;;  %p39_p10 = por %p38_p2, %p37_p13 }
  0x70   : > { %s229_s8 = sand.u32 1, %s1433_s20   ;;  %s837_s27 = sshll.u32 %s1437_s21, 8 }
  0x71   : > { %s825_s9 = sshll.u32 %s229_s8, 4  ;;  %s1646_s13 = scalar_lea.hbm %s1774_s0, %s837_s27 }
  0x72   : > { %s233_s14 = scalar_lea.vmem [#allocation2], %s825_s9  ;;  %p1650_p11 = pnand %p1172_p8, %p39_p10 }
  0x73   : > { %s240_s7 = sshll.u32 %s233_s14, 4  ;;  %s1654_s6 = scalar_lea.sflag [#allocation3], %s229_s8  ;;  %s1648_s7 = int_to_ptr.vmem [resolvable:$true] %s240_s7 }
  0x74   : > { %s1333_s29 = scalar_lea.hbm %s1646_s13, 256  ;;  %p1335_p0 = pneg %p1650_p11 }
  0x75   : > { %p1334_p12 = scmp.ne.s32.totalorder %s1646_s13, %s1333_s29  ;;  %s1338_s27 = scalar_lea.hbm %s1774_s0, 512 }
  0x76   : > { %p1339_p7 = scmp.lt.u32.totalorder %s1646_s13, %s1774_s0  ;;  %p1340_p9 = scmp.lt.u32.totalorder %s1338_s27, %s1333_s29 }
  0x77   : > { %p1336_p3 = pnand %p1335_p0, %p1334_p12  ;;  %p1342_p1 = scmp.lt.u32.totalorder %s1333_s29, %s1646_s13 }
  0x78   : > { %p1341_p13 = por %p1340_p9, %p1339_p7 }
  0x79   : > { %p1337_p5 = pneg %p1336_p3 }
  0x7a   : > { %p1343_p2 = por %p1342_p1, %p1341_p13 }
  0x7c   : > { %p1344_p4 = pnand %p1343_p2, %p1337_p5 }
  0x7e   : > { %1347 = shalt.err (!%p1344_p4)
}
  0x7f   : > { %s1348_s8 = scalar_lea.vmem %s1648_s7, 256  ;;  %s1447_s14 = smov [#allocation2]  }
  0x80   : > { %p1349_p8 = scmp.ne.s32.totalorder %s1648_s7, %s1348_s8  ;;  %s1353_s28 = sshll.u32 %s1447_s14, 4  ;;  %s1354_s28 = int_to_ptr.vmem [resolvable:$false] %s1353_s28 }
  0x81   : > { %s1355_s9 = scalar_lea.vmem %s1354_s28, 512  ;;  %p1356_p3 = scmp.lt.s32.totalorder %s1648_s7, %s1354_s28 }
  0x82   : > { %p1351_p10 = pnand %p1349_p8, %p1335_p0  ;;  %p1357_p7 = scmp.lt.s32.totalorder %s1355_s9, %s1348_s8 }
  0x84   : > { %p1352_p12 = pneg %p1351_p10  ;;  %p1358_p9 = por %p1357_p7, %p1356_p3 }
  0x86   : > { %p1359_p13 = pnand %p1358_p9, %p1352_p12 }
  0x88   : > { %1362 = shalt.err (!%p1359_p13)
}
  0x89   : > { %1163 = dma.hbm_to_vmem [thread:$0]  (!%p1650_p11), %s1646_s13, 256, %s1648_s7, %s1654_s6, %s1444_s16, %s1444_s16, %s1445_s17  }
  0x8a   : > { %p1791_p0 = scmp.ne.s32.totalorder %s1785_s26, 0 }
  0x8b   : > { %s1688_s29 = sand.u32 (!%p1791_p0), 1, %s1429_s19   ;;  %p1792_p5 = scmp.ne.s32.totalorder (!%p1791_p0), %s1783_s24, 0 }
  0x8c   : > { %252 = sbr.rel (%p1791_p0) target bundleno = 640 (0x280), region = 40  ;;  %s829_s27 = sshll.u32 (!%p1791_p0), %s1688_s29, 4 }
  0x8d   : > { %s255_s10 = scalar_lea.sflag (!%p1791_p0), [#allocation3], %s1688_s29  ;;  %s1692_s11 = scalar_lea.vmem (!%p1791_p0), [#allocation2], %s829_s27 }
  0x93   : > { %1408 = dma.done.wait (%p1792_p5), %s255_s10, 256  }
  0x94   : > { %1410 = vsyncadd (%p1792_p5), %s255_s10, 4294967040  ;;  %p1793_p11 = scmp.eq.s32.totalorder %s1503_s22, 0 }
  0x96   : > { %1412 = dma.done.wait (%p1793_p11), [#allocation6], 6400   ;;  %p1794_p1 = pmov %p1793_p11 }
  0x98   : > { %1414 = vsyncadd (%p1794_p1), [#allocation6], 4294960896  ;;  %p1795_p2 = pmov %p1794_p1 }
  0x99   : > { %p1796_p4 = pmov %p1794_p1 }
  0x9a   : > { %1416 = dma.done.wait (%p1795_p2), [#allocation9], 2304  }
  0x9b   : > { %1418 = vsyncadd (%p1796_p4), [#allocation9], 4294964992  ;;  %v1448_v0 = vmov 0.0   ;;  %v304_v1 = vld [vmem:[#allocation5 + $0x8] sm:$0xff]  ;;  %v307_v2 = vld [vmem:[#allocation5 + $0x20] sm:$0xff]  ;;  %s1125_s24 = smul.u32 48, %s1688_s29 }
  0x9c   : > { %415 = vmatprep.mubr.f32.mxu0 %v1448_v0  ;;  %v303_v3 = vld [vmem:[#allocation5] sm:$0xff]  ;;  %v997_v4 = vpack.c.bf16 %v307_v2, %v304_v1  ;;  %v306_v5 = vld [vmem:[#allocation5 + $0x18] sm:$0xff]  ;;  %v313_v7 = vld [vmem:[#allocation5 + $0x50] sm:$0xff]  ;;  %s1126_s17 = smul.u32 768, %s1503_s22  ;;  %s694_s15 = scalar_lea.sflag [#allocation4], %s1688_s29 }
  0x9d   : > { %v310_v6 = vld [vmem:[#allocation5 + $0x38] sm:$0xff]  ;;  %v999_v8 = vpack.c.bf16 %v306_v5, %v303_v3  ;;  %v309_v10 = vld [vmem:[#allocation5 + $0x30] sm:$0xff]  ;;  %v312_v11 = vld [vmem:[#allocation5 + $0x48] sm:$0xff]  ;;  %s1715_s26 = scalar_lea.vmem [#allocation11], %s1125_s24  ;;  %s1449_s8 = smov [#allocation11]  }
  0x9e   : > { %v1001_v9 = vpack.c.bf16 %v313_v7, %v310_v6  ;;  %v316_v12 = vld [vmem:[#allocation5 + $0x68] sm:$0xff]  ;;  %998 = vmatprep.subr.bf16.mxu0 %v997_v4  ;;  %v319_v13 = vld [vmem:[#allocation5 + $0x80] sm:$0xff]  ;;  %v1003_v14 = vpack.c.bf16 %v312_v11, %v309_v10  ;;  %v318_v17 = vld [vmem:[#allocation5 + $0x78] sm:$0xff]  ;;  %s707_s16 = sshll.u32 %s1715_s26, 4  ;;  %s1726_s7 = scalar_lea.hbm %s1779_s5, %s1126_s17  ;;  %s1721_s16 = int_to_ptr.vmem [resolvable:$true] %s707_s16 }
  0x9f   : > { %1000 = vmatpush1.bf16.msra.mxu0 %v999_v8  ;;  %v1005_v15 = vpack.c.bf16 %v319_v13, %v316_v12  ;;  %v315_v16 = vld [vmem:[#allocation5 + $0x60] sm:$0xff]  ;;  %v322_v18 = vld [vmem:[#allocation5 + $0x98] sm:$0xff]  ;;  %v325_v19 = vld [vmem:[#allocation5 + $0xb0] sm:$0xff]  ;;  %s1363_s6 = scalar_lea.vmem %s1721_s16, 768  ;;  %s1367_s14 = sshll.u32 %s1449_s8, 4  ;;  %s1368_s14 = int_to_ptr.vmem [resolvable:$false] %s1367_s14 }
  0xa0   : > { %1002 = vmatprep.subr.bf16.mxu0 %v1001_v9  ;;  %v1007_v20 = vpack.c.bf16 %v318_v17, %v315_v16  ;;  %v1009_v21 = vpack.c.bf16 %v325_v19, %v322_v18  ;;  %v321_v22 = vld [vmem:[#allocation5 + $0x90] sm:$0xff]  ;;  %v324_v23 = vld [vmem:[#allocation5 + $0xa8] sm:$0xff]  ;;  %v331_v25 = vld [vmem:[#allocation5 + $0xe0] sm:$0xff]  ;;  %p1364_p8 = scmp.ne.s32.totalorder %s1721_s16, %s1363_s6  ;;  %s1369_s28 = scalar_lea.vmem %s1368_s14, 1536 }
  0xa1   : > { %v328_v24 = vld [vmem:[#allocation5 + $0xc8] sm:$0xff]  ;;  %v1708_v26 = vld [vmem:[%s1692_s11] sm:$0xff]  ;;  %v1011_v29 = vpack.c.bf16 %v324_v23, %v321_v22  ;;  %v314_v33 = vld [vmem:[#allocation5 + $0x58] sm:$0xff]  ;;  %p1370_p3 = scmp.lt.s32.totalorder %s1721_s16, %s1368_s14  ;;  %p1371_p7 = scmp.lt.s32.totalorder %s1369_s28, %s1363_s6 }
  0xa2   : > { %v305_v27 = vld [vmem:[#allocation5 + $0x10] sm:$0xff]  ;;  %v308_v28 = vld [vmem:[#allocation5 + $0x28] sm:$0xff]  ;;  %924 = vmatprep.mubr.f32.mxu1 %v1708_v26  ;;  %v327_v30 = vld [vmem:[#allocation5 + $0xc0] sm:$0xff]  ;;  %v1013_v34 = vpack.c.bf16 %v331_v25, %v328_v24  ;;  %p1365_p10 = pnand %p1364_p8, %p1633_p6 }
  0xa3   : > { %1004 = vmatpush1.bf16.msra.mxu0 %v1003_v14  ;;  %v1029_v31 = vpack.c.bf16 %v308_v28, %v305_v27  ;;  %v311_v32 = vld [vmem:[#allocation5 + $0x40] sm:$0xff]  ;;  %v330_v35 = vld [vmem:[#allocation5 + $0xd8] sm:$0xff]  ;;  %v317_v37 = vld [vmem:[#allocation5 + $0x70] sm:$0xff]  ;;  %p1372_p9 = por %p1371_p7, %p1370_p3 }
  0xa4   : > { %1006 = vmatprep.subr.bf16.mxu0 %v1005_v15  ;;  %v1033_v36 = vpack.c.bf16 %v314_v33, %v311_v32  ;;  %v320_v38 = vld [vmem:[#allocation5 + $0x88] sm:$0xff]  ;;  %v334_v39 = vld [vmem:[#allocation5 + $0xf8] sm:$0xff]  ;;  %v337_v40 = vld [vmem:[#allocation5 + $0x110] sm:$0xff]  ;;  %v1015_v41 = vpack.c.bf16 %v330_v35, %v327_v30  ;;  %p1366_p12 = pneg %p1365_p10 }
  0xa5   : > { %1030 = vmatprep.subr.bf16.mxu1 %v1029_v31  ;;  %v333_v42 = vld [vmem:[#allocation5 + $0xf0] sm:$0xff]  ;;  %v1037_v43 = vpack.c.bf16 %v320_v38, %v317_v37  ;;  %v1017_v44 = vpack.c.bf16 %v337_v40, %v334_v39  ;;  %v336_v45 = vld [vmem:[#allocation5 + $0x108] sm:$0xff]  ;;  %v323_v46 = vld [vmem:[#allocation5 + $0xa0] sm:$0xff] }
  0xa6   : > { %1032 = vmatpush3.bf16.msra.mxu1 %v1029_v31  ;;  %v326_v47 = vld [vmem:[#allocation5 + $0xb8] sm:$0xff]  ;;  %v340_v48 = vld [vmem:[#allocation5 + $0x128] sm:$0xff]  ;;  %v343_v49 = vld [vmem:[#allocation5 + $0x140] sm:$0xff]  ;;  %v1019_v50 = vpack.c.bf16 %v336_v45, %v333_v42  ;;  %p1373_p13 = pnand %p1372_p9, %p1366_p12 }
  0xa7   : > { %1008 = vmatpush1.bf16.msra.mxu0 %v1007_v20  ;;  %1034 = vmatprep.subr.bf16.mxu1 %v1033_v36  ;;  %v339_v51 = vld [vmem:[#allocation5 + $0x120] sm:$0xff]  ;;  %v1041_v52 = vpack.c.bf16 %v326_v47, %v323_v46  ;;  %v1021_v53 = vpack.c.bf16 %v343_v49, %v340_v48  ;;  %v342_v54 = vld [vmem:[#allocation5 + $0x138] sm:$0xff]  ;;  %v329_v55 = vld [vmem:[#allocation5 + $0xd0] sm:$0xff] }
  0xa8   : > { %1010 = vmatprep.subr.bf16.mxu0 %v1009_v21  ;;  %v332_v56 = vld [vmem:[#allocation5 + $0xe8] sm:$0xff]  ;;  %v346_v57 = vld [vmem:[#allocation5 + $0x158] sm:$0xff]  ;;  %v349_v58 = vld [vmem:[#allocation5 + $0x170] sm:$0xff]  ;;  %v1023_v59 = vpack.c.bf16 %v342_v54, %v339_v51 }
  0xa9   : > { %v345_v60 = vld [vmem:[#allocation5 + $0x150] sm:$0xff]  ;;  %v1045_v61 = vpack.c.bf16 %v332_v56, %v329_v55  ;;  %v1025_v62 = vpack.c.bf16 %v349_v58, %v346_v57  ;;  %v348_v63 = vld [vmem:[#allocation5 + $0x168] sm:$0xff]  ;;  %v335_v1 = vld [vmem:[#allocation5 + $0x100] sm:$0xff] }
  0xaa   : > { %1036 = vmatpush3.bf16.msra.mxu1 %v1033_v36  ;;  %v338_v2 = vld [vmem:[#allocation5 + $0x118] sm:$0xff]  ;;  %v507_v3 = vld [vmem:[#allocation10] sm:$0xff]  ;;  %v508_v4 = vld [vmem:[#allocation10 + $0x8] sm:$0xff]  ;;  %v1027_v5 = vpack.c.bf16 %v348_v63, %v345_v60 }
  0xab   : > { %1012 = vmatpush1.bf16.msra.mxu0 %v1011_v29  ;;  %1038 = vmatprep.subr.bf16.mxu1 %v1037_v43  ;;  %v1049_v6 = vpack.c.bf16 %v338_v2, %v335_v1  ;;  %v341_v7 = vld [vmem:[#allocation5 + $0x130] sm:$0xff]  ;;  %v344_v8 = vld [vmem:[#allocation5 + $0x148] sm:$0xff]  ;;  %v1061_v9 = vpack.c.bf16 %v508_v4, %v507_v3  ;;  %v510_v11 = vld [vmem:[#allocation10 + $0x18] sm:$0xff] }
  0xac   : > { %1014 = vmatprep.subr.bf16.mxu0 %v1013_v34  ;;  %v509_v10 = vld [vmem:[#allocation10 + $0x10] sm:$0xff]  ;;  %v1053_v12 = vpack.c.bf16 %v344_v8, %v341_v7  ;;  %v347_v13 = vld [vmem:[#allocation5 + $0x160] sm:$0xff]  ;;  %v350_v14 = vld [vmem:[#allocation5 + $0x178] sm:$0xff] }
  0xad   : > { %v1065_v15 = vpack.c.bf16 %v510_v11, %v509_v10  ;;  %v511_v16 = vld [vmem:[#allocation10 + $0x20] sm:$0xff]  ;;  %v512_v17 = vld [vmem:[#allocation10 + $0x28] sm:$0xff]  ;;  %v1057_v19 = vpack.c.bf16 %v350_v14, %v347_v13  ;;  %v513_v21 = vld [vmem:[#allocation10 + $0x30] sm:$0xff] }
  0xae   : > { %1040 = vmatpush3.bf16.msra.mxu1 %v1037_v43  ;;  %v302_v18 = vld [vmem:[%s1692_s11 + $0x8] sm:$0xff]  ;;  %v1069_v20 = vpack.c.bf16 %v512_v17, %v511_v16  ;;  %v515_v24 = vld [vmem:[#allocation10 + $0x40] sm:$0xff]  ;;  %v521_v32 = vld [vmem:[#allocation10 + $0x70] sm:$0xff] }
  0xaf   : > { %1016 = vmatpush1.bf16.msra.mxu0 %v1015_v41  ;;  %1042 = vmatprep.subr.bf16.mxu1 %v1041_v52  ;;  %v514_v22 = vld [vmem:[#allocation10 + $0x38] sm:$0xff]  ;;  %v516_v25 = vld [vmem:[#allocation10 + $0x48] sm:$0xff]  ;;  %v519_v29 = vld [vmem:[#allocation10 + $0x60] sm:$0xff] }
  0xb0   : > { %1018 = vmatprep.subr.bf16.mxu0 %v1017_v44  ;;  %v1073_v23 = vpack.c.bf16 %v514_v22, %v513_v21  ;;  %v518_v27 = vld [vmem:[#allocation10 + $0x58] sm:$0xff]  ;;  %v520_v30 = vld [vmem:[#allocation10 + $0x68] sm:$0xff]  ;;  %v503_v43 = vld [vmem:[#allocation7] sm:$0xff] }
  0xb1   : > { %v1085_v31 = vpack.c.bf16 %v520_v30, %v519_v29  ;;  %v522_v33 = vld [vmem:[#allocation10 + $0x78] sm:$0xff]  ;;  %v504_v41 = vld [vmem:[#allocation7 + $0x8] sm:$0xff]  ;;  %v505_v44 = vld [vmem:[#allocation8] sm:$0xff] }
  0xb2   : > { %1044 = vmatpush3.bf16.msra.mxu1 %v1041_v52  ;;  %v1089_v34 = vpack.c.bf16 %v522_v33, %v521_v32  ;;  %v506_v42 = vld [vmem:[#allocation8 + $0x8] sm:$0xff] }
  0xb3   : > { %1020 = vmatpush1.bf16.msra.mxu0 %v1019_v50  ;;  %1046 = vmatprep.subr.bf16.mxu1 %v1045_v61 }
  0xb4   : > { %1022 = vmatprep.subr.bf16.mxu0 %v1021_v53 }
  0xb6   : > { %1048 = vmatpush3.bf16.msra.mxu1 %v1045_v61 }
  0xb7   : > { %1024 = vmatpush1.bf16.msra.mxu0 %v1023_v59  ;;  %1050 = vmatprep.subr.bf16.mxu1 %v1049_v6 }
  0xb8   : > { %1026 = vmatprep.subr.bf16.mxu0 %v1025_v62 }
  0xba   : > { %1052 = vmatpush3.bf16.msra.mxu1 %v1049_v6 }
  0xbb   : > { %1028 = vmatpush1.bf16.msra.mxu0 %v1027_v5  ;;  %1054 = vmatprep.subr.bf16.mxu1 %v1053_v12 }
  0xbc   : > { %1062 = vmatprep.subr.bf16.mxu0 %v1061_v9 }
  0xbe   : > { %416 = vmatmul.mubr.f32.vlgmr.msra.gmra.mrb[0].mxu0 %v1708_v26  ;;  %1056 = vmatpush3.bf16.msra.mxu1 %v1053_v12  ;;  %v517_v26 = vld [vmem:[#allocation10 + $0x50] sm:$0xff] }
  0xbf   : > { %421 = vmatprep.mubr.f32.mxu0 %v1448_v0  ;;  %1064 = vmatpush3.bf16.msra.mxu0 %v1061_v9  ;;  %v1077_v0 = vpack.c.bf16 %v516_v25, %v515_v24  ;;  %v1081_v28 = vpack.c.bf16 %v518_v27, %v517_v26 }
  0xc0   : > { %1066 = vmatprep.subr.bf16.mxu0 %v1065_v15  ;;  %1058 = vmatprep.subr.bf16.mxu1 %v1057_v19 }
  0xc2   : > { %422 = vmatmul.mubr.f32.gmra.mrb[2].mxu0 %v302_v18  ;;  %1060 = vmatpush3.bf16.msra.mxu1 %v1057_v19 }
  0xc3   : > { %1068 = vmatpush3.bf16.msra.mxu0 %v1065_v15  ;;  %1094 = vmatprep.subr.bf16.mxu1 %v1061_v9 }
  0xc4   : > { %1070 = vmatprep.subr.bf16.mxu0 %v1069_v20 }
  0xc5   : > { %925 = vmatmul.mubr.f32.vlgmr.msra.gmra.mrb[0].mxu1 %v302_v18 }
  0xc6   : > { %1096 = vmatpush3.bf16.msra.mxu1 %v1061_v9 }
  0xc7   : > { %1072 = vmatpush3.bf16.msra.mxu0 %v1069_v20  ;;  %1098 = vmatprep.subr.bf16.mxu1 %v1065_v15 }
  0xc8   : > { %1074 = vmatprep.subr.bf16.mxu0 %v1073_v23 }
  0xca   : > { %1100 = vmatpush3.bf16.msra.mxu1 %v1065_v15 }
  0xcb   : > { %1076 = vmatpush3.bf16.msra.mxu0 %v1073_v23  ;;  %1102 = vmatprep.subr.bf16.mxu1 %v1069_v20 }
  0xcc   : > { %1078 = vmatprep.subr.bf16.mxu0 %v1077_v0 }
  0xce   : > { %1104 = vmatpush3.bf16.msra.mxu1 %v1069_v20 }
  0xcf   : > { %1080 = vmatpush3.bf16.msra.mxu0 %v1077_v0  ;;  %1106 = vmatprep.subr.bf16.mxu1 %v1073_v23 }
  0xd0   : > { %1082 = vmatprep.subr.bf16.mxu0 %v1081_v28 }
  0xd2   : > { %1108 = vmatpush3.bf16.msra.mxu1 %v1073_v23 }
  0xd3   : > { %1084 = vmatpush3.bf16.msra.mxu0 %v1081_v28  ;;  %1110 = vmatprep.subr.bf16.mxu1 %v1077_v0 }
  0xd4   : > { %1086 = vmatprep.subr.bf16.mxu0 %v1085_v31 }
  0xd6   : > { %1112 = vmatpush3.bf16.msra.mxu1 %v1077_v0 }
  0xd7   : > { %1088 = vmatpush3.bf16.msra.mxu0 %v1085_v31  ;;  %1114 = vmatprep.subr.bf16.mxu1 %v1081_v28 }
  0xd8   : > { %1090 = vmatprep.subr.bf16.mxu0 %v1089_v34 }
  0xda   : > { %1116 = vmatpush3.bf16.msra.mxu1 %v1081_v28 }
  0xdb   : > { %1118 = vmatprep.subr.bf16.mxu1 %v1085_v31  ;;  %1092 = vmatpush3.bf16.msra.mxu0 %v1089_v34 }
  0xde   : > { %1120 = vmatpush3.bf16.msra.mxu1 %v1085_v31 }
  0xdf   : > { %1122 = vmatprep.subr.bf16.mxu1 %v1089_v34 }
  0xe2   : > { %1124 = vmatpush3.bf16.msra.mxu1 %v1089_v34 }
 0x191   : > { %v417_v35 = vpop.f32.mrb[0].mxu0 }
 0x192   : > { %v419_v36 = vpop.f32.mrb[1].mxu0  ;;  %959 = vmatprep.mubr.f32.mxu0 %v417_v35  ;;  %v673_v50 = vmul.f32 %v503_v43, %v417_v35 }
 0x193   : > { %994 = vmatprep.mubr.f32.mxu1 %v419_v36  ;;  %v679_v55 = vmul.f32 %v503_v43, %v419_v36 }
 0x195   : > { %v423_v37 = vpop.f32.mrb[2].mxu0 }
 0x196   : > { %v425_v38 = vpop.f32.mrb[3].mxu0  ;;  %960 = vmatmul.mubr.f32.vlgmr.msra.gmra.mrb[4].mxu0 %v423_v37  ;;  %v674_v46 = vmul.f32 %v504_v41, %v423_v37 }
 0x197   : > { %995 = vmatmul.mubr.f32.vlgmr.msra.gmra.mrb[2].mxu1 %v425_v38  ;;  %v680_v51 = vmul.f32 %v504_v41, %v425_v38 }
 0x198   : > { %v926_v39 = vpop.f32.mrb[0].mxu1 }
 0x199   : > { %692 = vst [vmem:[%s1715_s26 + $0x28] sm:$0xff] %v926_v39  ;;  %v494_v40 = vpop.f32.mrb[1].mxu1 }
 0x19a   : > { %691 = vst [vmem:[%s1715_s26 + $0x10] sm:$0xff] %v494_v40 }
 0x269   : > { %v961_v45 = vpop.f32.mrb[4].mxu0 }
 0x26a   : > { %v676_v47 = vmul.f32 %v961_v45, %v506_v42  ;;  %v589_v48 = vpop.f32.mrb[5].mxu0  ;;  %v996_v49 = vpop.f32.mrb[2].mxu1 }
 0x26b   : > { %v675_v52 = vmul.f32 %v589_v48, %v505_v44  ;;  %v682_v53 = vmul.f32 %v996_v49, %v506_v42  ;;  %v664_v54 = vpop.f32.mrb[3].mxu1 }
 0x26c   : > { %v678_v56 = vadd.f32 %v676_v47, %v674_v46  ;;  %v681_v57 = vmul.f32 %v664_v54, %v505_v44 }
 0x26d   : > { %v677_v58 = vadd.f32 %v675_v52, %v673_v50  ;;  %v684_v59 = vadd.f32 %v682_v53, %v680_v51 }
 0x26e   : > { %v686_v60 = vmul.f32 0.17677669, %v678_v56  ;;  %v683_v61 = vadd.f32 %v681_v57, %v679_v55 }
 0x26f   : > { %v685_v62 = vmul.f32 0.17677669, %v677_v58  ;;  %690 = vst [vmem:[%s1715_s26 + $0x20] sm:$0xff] %v684_v59 }
 0x270   : > { %688 = vst [vmem:[%s1715_s26 + $0x18] sm:$0xff] %v686_v60  ;;  %689 = vst [vmem:[%s1715_s26 + $0x8] sm:$0xff] %v683_v61 }
 0x271   : > { %687 = vst [vmem:[%s1715_s26] sm:$0xff] %v685_v62 }
 0x272   : > { %1376 = shalt.err (!%p1373_p13)
}
 0x273   : > { %s1377_s9 = scalar_lea.hbm %s1726_s7, 768  ;;  %s1381_s11 = scalar_lea.hbm %s1779_s5, 1536 }
 0x274   : > { %p1378_p0 = scmp.ne.s32.totalorder %s1726_s7, %s1377_s9  ;;  %p1382_p1 = scmp.lt.u32.totalorder %s1726_s7, %s1779_s5 }
 0x275   : > { %p1383_p2 = scmp.lt.u32.totalorder %s1381_s11, %s1377_s9  ;;  %p1385_p8 = scmp.lt.u32.totalorder %s1377_s9, %s1726_s7 }
 0x276   : > { %p1379_p5 = pnand %p1378_p0, %p1633_p6 }
 0x277   : > { %p1384_p4 = por %p1383_p2, %p1382_p1 }
 0x278   : > { %p1380_p11 = pneg %p1379_p5 }
 0x279   : > { %p1386_p10 = por %p1385_p8, %p1384_p4 }
 0x27b   : > { %p1387_p12 = pnand %p1386_p10, %p1380_p11 }
 0x27d   : > { %1390 = shalt.err (!%p1387_p12)
}
 0x27e   : > { %s1450_s17 = smov 384   ;;  %s1451_s22 = smov 24  }
 0x27f   : > { %1145 = dma.vmem_to_hbm [thread:$0]  (%p1633_p6), %s1721_s16, 768, %s1726_s7, %s694_s15, %s1450_s17, %s1450_s17, %s1451_s22  }
 0x280 PF: > { %s722_s13 = sand.u32 1, %s1425_s18   ;;  %p1797_p3 = scmp.ne.s32.totalorder %s1784_s25, 0 }
 0x281   : > { %p1798_p7 = scmp.ge.s32.totalorder %s1437_s21, 2  ;;  %s723_s6 = scalar_lea.sflag [#allocation4], %s722_s13 }
 0x283   : > { %p1165_p9 = pnand %p1798_p7, %p1797_p3 }
 0x285   : > { %1420 = dma.done.wait (!%p1165_p9), %s723_s6, 768  }
 0x286   : > { %1422 = vsyncadd (!%p1165_p9), %s723_s6, 4294966528  ;;  %p20_p13 = scmp.ge.s32.totalorder %s1623_s12, 4   ;;  %s1799_s18 = smov %s1429_s19 }
 0x287   : > { %s1800_s19 = smov %s1433_s20  ;;  %s1801_s20 = smov %s1639_s30 }
 0x288   : > { %s1802_s21 = smov %s1623_s12  ;;  %22 = sbr.rel (!%p20_p13) target bundleno = 7 (0x7), region = 101 }
 0x28f   :  { %728 = vsyncpa [#allocation3], 1 }
 0x290   :  { %730 = vsyncpa [#allocation3 + $0x1], 1 }
 0x291   :  { %731 = vsyncpa [#allocation6], 1 }
 0x292   :  { %732 = vsyncpa [#allocation9], 1 }
 0x293   :  { %733 = vsyncpa [#allocation4], 1 }
 0x294   :  { %735 = vsyncpa [#allocation4 + $0x1], 1 }

</bundles_post_ra>
